<compile_context>
chip_gen: v5e
topology: v5e:2x2
jax: 0.10.0
libtpu: 0.0.40
codegen_flags: <defaults>
</compile_context>

<pallas_src>
import functools

import jax
import jax.numpy as jnp
from jax.experimental import pallas as pl
from jax.experimental.pallas import tpu as pltpu

EPS = 1e-5
NEG_SLOPE = 0.01
FEATURES = 128
HIDDEN = 64


def _default_max_tile_m():
    # 8192 rows (4 MiB f32 x-tile) on v7x, 4096 elsewhere; both comfortably
    # fit the scoped-VMEM default with double-buffered in + out + weights.
    try:
        kind = jax.devices()[0].device_kind.lower()
    except Exception:
        return 4096
    return 8192 if "v7" in kind else 4096


def _leaky(x):
    # max(x, a*x): 2 VALU ops/elem instead of 3 for where(x>=0, x, a*x).
    return jnp.maximum(x, NEG_SLOPE * x)


def _valid_rows(tile_idx, true_n, tile_m):
    rows = tile_idx * tile_m + jax.lax.broadcasted_iota(jnp.int32, (tile_m, 1), 0)
    return rows < true_n


# ---------- pass 1: BN1 per-tile partial statistics --------------------------
def _bn1_stats_kernel(x_ref, w1_ref, b1_ref, stats_ref,
                      *, true_n, tile_m, need_mask):
    h = _leaky(jnp.dot(x_ref[...], w1_ref[...],
                       preferred_element_type=jnp.float32) + b1_ref[...])
    if need_mask:
        # where (not multiply): ragged-block rows are uninitialized garbage.
        h = jnp.where(_valid_rows(pl.program_id(0), true_n, tile_m), h, 0.0)
    ssum = jnp.sum(h, axis=0, keepdims=True)
    ssq = jnp.sum(h * h, axis=0, keepdims=True)
    stats_ref[...] = jnp.concatenate([ssum, ssq], axis=0).reshape(1, 2, FEATURES)


# ---------- pass 2: BN2 per-tile partial statistics (BN1 folded in W2/b2) ----
def _bn2_stats_kernel(x_ref, w1_ref, b1_ref, w2_ref, b2_ref, stats_ref,
                      *, true_n, tile_m, need_mask):
    h = _leaky(jnp.dot(x_ref[...], w1_ref[...],
                       preferred_element_type=jnp.float32) + b1_ref[...])
    y = _leaky(jnp.dot(h, w2_ref[...],
                       preferred_element_type=jnp.float32) + b2_ref[...])
    if need_mask:
        y = jnp.where(_valid_rows(pl.program_id(0), true_n, tile_m), y, 0.0)
    ssum = jnp.sum(y, axis=0, keepdims=True)
    ssq = jnp.sum(y * y, axis=0, keepdims=True)
    stats_ref[...] = jnp.concatenate([ssum, ssq], axis=0).reshape(1, 2, FEATURES)


# ---------- pass 3: apply BN2 affine, write output ----------------------------
def _output_kernel(x_ref, w1_ref, b1_ref, w2_ref, b2_ref, sc2_ref, sh2_ref, o_ref):
    h = _leaky(jnp.dot(x_ref[...], w1_ref[...],
                       preferred_element_type=jnp.float32) + b1_ref[...])
    y = _leaky(jnp.dot(h, w2_ref[...],
                       preferred_element_type=jnp.float32) + b2_ref[...])
    o_ref[...] = (y * sc2_ref[...] + sh2_ref[...]).astype(o_ref.dtype)


# ---------- wrapper -----------------------------------------------------------
def _prepare_params(params):
    """Transpose to (in,out) and zero-pad the 64-wide hidden path to 128 lanes."""
    w1, b1, g1, be1, w2, b2, g2, be2 = params
    row = lambda v: jnp.pad(v.astype(jnp.float32).reshape(1, -1),
                            ((0, 0), (0, FEATURES - v.reshape(1, -1).shape[-1])))
    # NOTE: zero-padding of b1/g1/be1 (lanes 64..127) is what keeps the padded
    # hidden lanes exactly zero through BN1; keep this invariant.
    w1t = jnp.pad(w1.T.astype(jnp.float32), ((0, 0), (0, FEATURES - HIDDEN)))
    w2t = jnp.pad(w2.T.astype(jnp.float32), ((0, FEATURES - HIDDEN), (0, 0)))
    return w1t, row(b1), row(g1), row(be1), w2t, row(b2), row(g2), row(be2)


def leaky_relu_head(x, params, *, max_tile_m=None):
    """x: (N, 128) float32 -> (N, 128) float32 (training-mode BatchNorm1d)."""
    n, f = x.shape
    assert f == FEATURES
    if max_tile_m is None:
        max_tile_m = _default_max_tile_m()
    max_tile_m = ((max_tile_m + 7) // 8) * 8

    w1t, b1p, g1p, be1p, w2t, b2p, g2p, be2p = _prepare_params(params)
    x = x.astype(jnp.float32)

    # Tile selection: either one full-array block (always a legal block shape)
    # or max_tile_m-row blocks with a partial last block handled by Pallas.
    if n <= max_tile_m:
        tile_m = n
    else:
        tile_m = max_tile_m
    num_tiles = -(-n // tile_m)
    need_mask = (n % tile_m) != 0

    x_spec = pl.BlockSpec((tile_m, FEATURES), lambda i: (i, 0))
    const = lambda a: pl.BlockSpec(a.shape, lambda i: (0, 0))
    stats_shape = jax.ShapeDtypeStruct((num_tiles, 2, FEATURES), jnp.float32)
    stats_spec = pl.BlockSpec((1, 2, FEATURES), lambda i: (i, 0, 0))
    par = pltpu.CompilerParams(dimension_semantics=("parallel",))

    inv_n = 1.0 / n
    xbytes = n * FEATURES * 4
    wbytes = FEATURES * FEATURES * 4
    mm_flops = 2 * n * FEATURES * FEATURES
    stats_bytes = num_tiles * 2 * FEATURES * 4

    # Pass 1: stream x, emit per-tile BN1 partial sum / sum-of-squares.
    stats1 = pl.pallas_call(
        functools.partial(_bn1_stats_kernel, true_n=n, tile_m=tile_m,
                          need_mask=need_mask),
        out_shape=stats_shape,
        grid=(num_tiles,),
        in_specs=[x_spec, const(w1t), const(b1p)],
        out_specs=stats_spec,
        compiler_params=par,
        cost_estimate=pl.CostEstimate(flops=mm_flops + 5 * n * FEATURES,
                                      transcendentals=0,
                                      bytes_accessed=xbytes + wbytes + stats_bytes),
    )(x, w1t, b1p)
    stats1 = jnp.sum(stats1, axis=0)          # (2, 128)
    sum1, sumsq1 = stats1[0:1], stats1[1:2]

    # Fold BN1 (batch mean, biased var) into W2 / b2 as a per-feature affine.
    mu1 = sum1 * inv_n
    var1 = jnp.maximum(sumsq1 * inv_n - mu1 * mu1, 0.0)
    scale1 = g1p * jax.lax.rsqrt(var1 + EPS)
    shift1 = be1p - mu1 * scale1
    w2f = w2t * scale1.reshape(FEATURES, 1)
    b2f = b2p + shift1 @ w2t

    # Pass 2: stream x again, emit per-tile BN2 partial stats.
    stats2 = pl.pallas_call(
        functools.partial(_bn2_stats_kernel, true_n=n, tile_m=tile_m,
                          need_mask=need_mask),
        out_shape=stats_shape,
        grid=(num_tiles,),
        in_specs=[x_spec, const(w1t), const(b1p), const(w2f), const(b2f)],
        out_specs=stats_spec,
        compiler_params=par,
        cost_estimate=pl.CostEstimate(flops=2 * mm_flops + 8 * n * FEATURES,
                                      transcendentals=0,
                                      bytes_accessed=xbytes + 2 * wbytes + stats_bytes),
    )(x, w1t, b1p, w2f, b2f)
    stats2 = jnp.sum(stats2, axis=0)
    sum2, sumsq2 = stats2[0:1], stats2[1:2]

    mu2 = sum2 * inv_n
    var2 = jnp.maximum(sumsq2 * inv_n - mu2 * mu2, 0.0)
    scale2 = g2p * jax.lax.rsqrt(var2 + EPS)
    shift2 = be2p - mu2 * scale2

    # Pass 3: apply BN2 affine and write the output (partial last block's
    # out-of-range rows are dropped by Pallas, so no out[:n] slice needed).
    out = pl.pallas_call(
        _output_kernel,
        out_shape=jax.ShapeDtypeStruct((n, FEATURES), jnp.float32),
        grid=(num_tiles,),
        in_specs=[x_spec, const(w1t), const(b1p), const(w2f), const(b2f),
                  const(scale2), const(shift2)],
        out_specs=pl.BlockSpec((tile_m, FEATURES), lambda i: (i, 0)),
        compiler_params=par,
        cost_estimate=pl.CostEstimate(flops=2 * mm_flops + 8 * n * FEATURES,
                                      transcendentals=0,
                                      bytes_accessed=2 * xbytes + 2 * wbytes),
    )(x, w1t, b1p, w2f, b2f, scale2, shift2)

    # TODO(synk): BatchNorm running_mean/running_var buffers are not updated
    # (only training-mode batch statistics are implemented).
    return out


# ---------- init + reference ---------------------------------------------------
def init_params(key):
    """PyTorch-shaped params with nn.Linear / nn.BatchNorm1d default init."""
    k1, k2, k3, k4 = jax.random.split(key, 4)
    bound1 = 128.0 ** -0.5
    bound2 = 64.0 ** -0.5
    w1 = jax.random.uniform(k1, (HIDDEN, FEATURES), jnp.float32, -bound1, bound1)
    b1 = jax.random.uniform(k2, (HIDDEN,), jnp.float32, -bound1, bound1)
    w2 = jax.random.uniform(k3, (FEATURES, HIDDEN), jnp.float32, -bound2, bound2)
    b2 = jax.random.uniform(k4, (FEATURES,), jnp.float32, -bound2, bound2)
    g1 = jnp.ones((HIDDEN,), jnp.float32)
    be1 = jnp.zeros((HIDDEN,), jnp.float32)
    g2 = jnp.ones((FEATURES,), jnp.float32)
    be2 = jnp.zeros((FEATURES,), jnp.float32)
    return (w1, b1, g1, be1, w2, b2, g2, be2)


def _reference(x, params):
    """Pure-JAX reference matching the PyTorch module in training mode."""
    w1, b1, g1, be1, w2, b2, g2, be2 = params

    def bn(v, g, b):
        mu = jnp.mean(v, axis=0, keepdims=True)
        var = jnp.mean((v - mu) ** 2, axis=0, keepdims=True)
        return (v - mu) * jax.lax.rsqrt(var + EPS) * g + b

    h = x @ w1.T + b1
    h = jnp.where(h >= 0, h, NEG_SLOPE * h)
    h = bn(h, g1, be1)
    y = h @ w2.T + b2
    y = jnp.where(y >= 0, y, NEG_SLOPE * y)
    return bn(y, g2, be2)


if __name__ == "__main__":
    key = jax.random.PRNGKey(0)
    pkey, xkey = jax.random.split(key)
    params = init_params(pkey)

    run = jax.jit(leaky_relu_head, static_argnames=("max_tile_m",))

    # Small batch (single full-array block, no masking).
    x = jax.random.normal(xkey, (8, FEATURES), jnp.float32)
    out = jax.block_until_ready(run(x, params))
    assert out.shape == (8, FEATURES) and out.dtype == jnp.float32
    err = jnp.max(jnp.abs(out - _reference(x, params)))
    assert err < 1e-4, float(err)

    # Ragged multi-tile path (forced small tile): partial last block + row mask.
    x2 = jax.random.normal(jax.random.PRNGKey(1), (600, FEATURES), jnp.float32)
    out2 = jax.block_until_ready(run(x2, params, max_tile_m=256))
    err2 = jnp.max(jnp.abs(out2 - _reference(x2, params)))
    assert err2 < 1e-4, float(err2)

    # Default (large-tile) path on the same data.
    out3 = jax.block_until_ready(run(x2, params))
    err3 = jnp.max(jnp.abs(out3 - _reference(x2, params)))
    assert err3 < 1e-4, float(err3)

    print("KERNEL_OK")
</pallas_src>

<mosaic_0001>
module attributes {stable_mosaic.version = 11 : i64} {
  func.func @_bn1_stats_kernel(%arg0: i32, %arg1: memref<8x128xf32, #tpu.memory_space<vmem>>, %arg2: memref<128x128xf32, #tpu.memory_space<vmem>>, %arg3: memref<1x128xf32, #tpu.memory_space<vmem>>, %arg4: memref<1x2x128xf32, #tpu.memory_space<vmem>>) attributes {dimension_semantics = [#tpu.dimension_semantics<parallel>], iteration_bounds = array<i64: 1>, scalar_prefetch = 0 : i64, scratch_operands = 0 : i64, tpu.core_type = #tpu.core_type<tc>, window_params = [{transform_indices = @transform_0, window_bounds = array<i64: 8, 128>}, {pipeline_mode = #tpu.pipeline_mode<synchronous>, transform_indices = @transform_1, window_bounds = array<i64: 128, 128>}, {pipeline_mode = #tpu.pipeline_mode<synchronous>, transform_indices = @transform_2, window_bounds = array<i64: 1, 128>}, {transform_indices = @transform_3, window_bounds = array<i64: 1, 2, 128>}]} {
    %c0 = arith.constant 0 : index
    %c0_0 = arith.constant 0 : index
    %0 = vector.load %arg1[%c0, %c0_0] : memref<8x128xf32, #tpu.memory_space<vmem>>, vector<8x128xf32>
    %c0_1 = arith.constant 0 : index
    %c0_2 = arith.constant 0 : index
    %1 = vector.load %arg2[%c0_1, %c0_2] : memref<128x128xf32, #tpu.memory_space<vmem>>, vector<128x128xf32>
    %cst = arith.constant dense<0.000000e+00> : vector<8x128xf32>
    %2 = tpu.matmul %0, %1, %cst {dimension_numbers = #tpu.dot_dimension_numbers<[1], [0], [0], [1], [0, 0, 1, 1], [], []>} : vector<8x128xf32>, vector<128x128xf32>, vector<8x128xf32> -> vector<8x128xf32>
    %c0_3 = arith.constant 0 : index
    %c0_4 = arith.constant 0 : index
    %3 = vector.load %arg3[%c0_3, %c0_4] : memref<1x128xf32, #tpu.memory_space<vmem>>, vector<1x128xf32>
    %4 = vector.broadcast %3 : vector<1x128xf32> to vector<8x128xf32>
    %5 = arith.addf %2, %4 : vector<8x128xf32>
    %cst_5 = arith.constant 0.00999999977 : f32
    %6 = vector.broadcast %cst_5 : f32 to vector<8x128xf32>
    %7 = arith.mulf %6, %5 : vector<8x128xf32>
    %8 = arith.maximumf %5, %7 : vector<8x128xf32>
    %cst_6 = arith.constant dense<0.000000e+00> : vector<128xf32>
    %9 = vector.multi_reduction <add>, %8, %cst_6 [0] : vector<8x128xf32> to vector<128xf32>
    %10 = vector.shape_cast %9 : vector<128xf32> to vector<1x128xf32>
    %11 = arith.mulf %8, %8 : vector<8x128xf32>
    %cst_7 = arith.constant dense<0.000000e+00> : vector<128xf32>
    %12 = vector.multi_reduction <add>, %11, %cst_7 [0] : vector<8x128xf32> to vector<128xf32>
    %13 = vector.shape_cast %12 : vector<128xf32> to vector<1x128xf32>
    %14 = tpu.concatenate %10, %13 in 0 : vector<1x128xf32>, vector<1x128xf32> -> vector<2x128xf32>
    %15 = vector.shape_cast %14 : vector<2x128xf32> to vector<1x2x128xf32>
    %c0_8 = arith.constant 0 : index
    %c0_9 = arith.constant 0 : index
    %c0_10 = arith.constant 0 : index
    %16 = vector.load %arg4[%c0_8, %c0_9, %c0_10] : memref<1x2x128xf32, #tpu.memory_space<vmem>>, vector<1x2x128xf32>
    tpu.vector_store %arg4[%c0_8, %c0_9, %c0_10], %15 {strides = array<i32>} : memref<1x2x128xf32, #tpu.memory_space<vmem>>, vector<1x2x128xf32>,
    return
  }
  func.func @transform_0(%arg0: i32) -> (i32, i32) {
    %c0_i32 = arith.constant 0 : i32
    %c0_i32_0 = arith.constant 0 : i32
    return %arg0, %c0_i32 : i32, i32
  }
  func.func @transform_1(%arg0: i32) -> (i32, i32) {
    %c0_i32 = arith.constant 0 : i32
    %c0_i32_0 = arith.constant 0 : i32
    %c0_i32_1 = arith.constant 0 : i32
    return %c0_i32, %c0_i32_0 : i32, i32
  }
  func.func @transform_2(%arg0: i32) -> (i32, i32) {
    %c0_i32 = arith.constant 0 : i32
    %c0_i32_0 = arith.constant 0 : i32
    %c0_i32_1 = arith.constant 0 : i32
    return %c0_i32, %c0_i32_0 : i32, i32
  }
  func.func @transform_3(%arg0: i32) -> (i32, i32, i32) {
    %c0_i32 = arith.constant 0 : i32
    %c0_i32_0 = arith.constant 0 : i32
    %c0_i32_1 = arith.constant 0 : i32
    return %arg0, %c0_i32, %c0_i32_0 : i32, i32, i32
  }
}

module attributes {stable_mosaic.version = 11 : i64} {
  func.func @_bn2_stats_kernel(%arg0: i32, %arg1: memref<8x128xf32, #tpu.memory_space<vmem>>, %arg2: memref<128x128xf32, #tpu.memory_space<vmem>>, %arg3: memref<1x128xf32, #tpu.memory_space<vmem>>, %arg4: memref<128x128xf32, #tpu.memory_space<vmem>>, %arg5: memref<1x128xf32, #tpu.memory_space<vmem>>, %arg6: memref<1x2x128xf32, #tpu.memory_space<vmem>>) attributes {dimension_semantics = [#tpu.dimension_semantics<parallel>], iteration_bounds = array<i64: 1>, scalar_prefetch = 0 : i64, scratch_operands = 0 : i64, tpu.core_type = #tpu.core_type<tc>, window_params = [{transform_indices = @transform_0, window_bounds = array<i64: 8, 128>}, {pipeline_mode = #tpu.pipeline_mode<synchronous>, transform_indices = @transform_1, window_bounds = array<i64: 128, 128>}, {pipeline_mode = #tpu.pipeline_mode<synchronous>, transform_indices = @transform_2, window_bounds = array<i64: 1, 128>}, {pipeline_mode = #tpu.pipeline_mode<synchronous>, transform_indices = @transform_3, window_bounds = array<i64: 128, 128>}, {pipeline_mode = #tpu.pipeline_mode<synchronous>, transform_indices = @transform_4, window_bounds = array<i64: 1, 128>}, {transform_indices = @transform_5, window_bounds = array<i64: 1, 2, 128>}]} {
    %c0 = arith.constant 0 : index
    %c0_0 = arith.constant 0 : index
    %0 = vector.load %arg1[%c0, %c0_0] : memref<8x128xf32, #tpu.memory_space<vmem>>, vector<8x128xf32>
    %c0_1 = arith.constant 0 : index
    %c0_2 = arith.constant 0 : index
    %1 = vector.load %arg2[%c0_1, %c0_2] : memref<128x128xf32, #tpu.memory_space<vmem>>, vector<128x128xf32>
    %cst = arith.constant dense<0.000000e+00> : vector<8x128xf32>
    %2 = tpu.matmul %0, %1, %cst {dimension_numbers = #tpu.dot_dimension_numbers<[1], [0], [0], [1], [0, 0, 1, 1], [], []>} : vector<8x128xf32>, vector<128x128xf32>, vector<8x128xf32> -> vector<8x128xf32>
    %c0_3 = arith.constant 0 : index
    %c0_4 = arith.constant 0 : index
    %3 = vector.load %arg3[%c0_3, %c0_4] : memref<1x128xf32, #tpu.memory_space<vmem>>, vector<1x128xf32>
    %4 = vector.broadcast %3 : vector<1x128xf32> to vector<8x128xf32>
    %5 = arith.addf %2, %4 : vector<8x128xf32>
    %cst_5 = arith.constant 0.00999999977 : f32
    %6 = vector.broadcast %cst_5 : f32 to vector<8x128xf32>
    %7 = arith.mulf %6, %5 : vector<8x128xf32>
    %8 = arith.maximumf %5, %7 : vector<8x128xf32>
    %c0_6 = arith.constant 0 : index
    %c0_7 = arith.constant 0 : index
    %9 = vector.load %arg4[%c0_6, %c0_7] : memref<128x128xf32, #tpu.memory_space<vmem>>, vector<128x128xf32>
    %cst_8 = arith.constant dense<0.000000e+00> : vector<8x128xf32>
    %10 = tpu.matmul %8, %9, %cst_8 {dimension_numbers = #tpu.dot_dimension_numbers<[1], [0], [0], [1], [0, 0, 1, 1], [], []>} : vector<8x128xf32>, vector<128x128xf32>, vector<8x128xf32> -> vector<8x128xf32>
    %c0_9 = arith.constant 0 : index
    %c0_10 = arith.constant 0 : index
    %11 = vector.load %arg5[%c0_9, %c0_10] : memref<1x128xf32, #tpu.memory_space<vmem>>, vector<1x128xf32>
    %12 = vector.broadcast %11 : vector<1x128xf32> to vector<8x128xf32>
    %13 = arith.addf %10, %12 : vector<8x128xf32>
    %cst_11 = arith.constant 0.00999999977 : f32
    %14 = vector.broadcast %cst_11 : f32 to vector<8x128xf32>
    %15 = arith.mulf %14, %13 : vector<8x128xf32>
    %16 = arith.maximumf %13, %15 : vector<8x128xf32>
    %cst_12 = arith.constant dense<0.000000e+00> : vector<128xf32>
    %17 = vector.multi_reduction <add>, %16, %cst_12 [0] : vector<8x128xf32> to vector<128xf32>
    %18 = vector.shape_cast %17 : vector<128xf32> to vector<1x128xf32>
    %19 = arith.mulf %16, %16 : vector<8x128xf32>
    %cst_13 = arith.constant dense<0.000000e+00> : vector<128xf32>
    %20 = vector.multi_reduction <add>, %19, %cst_13 [0] : vector<8x128xf32> to vector<128xf32>
    %21 = vector.shape_cast %20 : vector<128xf32> to vector<1x128xf32>
    %22 = tpu.concatenate %18, %21 in 0 : vector<1x128xf32>, vector<1x128xf32> -> vector<2x128xf32>
    %23 = vector.shape_cast %22 : vector<2x128xf32> to vector<1x2x128xf32>
    %c0_14 = arith.constant 0 : index
    %c0_15 = arith.constant 0 : index
    %c0_16 = arith.constant 0 : index
    %24 = vector.load %arg6[%c0_14, %c0_15, %c0_16] : memref<1x2x128xf32, #tpu.memory_space<vmem>>, vector<1x2x128xf32>
    tpu.vector_store %arg6[%c0_14, %c0_15, %c0_16], %23 {strides = array<i32>} : memref<1x2x128xf32, #tpu.memory_space<vmem>>, vector<1x2x128xf32>,
    return
  }
  func.func @transform_0(%arg0: i32) -> (i32, i32) {
    %c0_i32 = arith.constant 0 : i32
    %c0_i32_0 = arith.constant 0 : i32
    return %arg0, %c0_i32 : i32, i32
  }
  func.func @transform_1(%arg0: i32) -> (i32, i32) {
    %c0_i32 = arith.constant 0 : i32
    %c0_i32_0 = arith.constant 0 : i32
    %c0_i32_1 = arith.constant 0 : i32
    return %c0_i32, %c0_i32_0 : i32, i32
  }
  func.func @transform_2(%arg0: i32) -> (i32, i32) {
    %c0_i32 = arith.constant 0 : i32
    %c0_i32_0 = arith.constant 0 : i32
    %c0_i32_1 = arith.constant 0 : i32
    return %c0_i32, %c0_i32_0 : i32, i32
  }
  func.func @transform_3(%arg0: i32) -> (i32, i32) {
    %c0_i32 = arith.constant 0 : i32
    %c0_i32_0 = arith.constant 0 : i32
    %c0_i32_1 = arith.constant 0 : i32
    return %c0_i32, %c0_i32_0 : i32, i32
  }
  func.func @transform_4(%arg0: i32) -> (i32, i32) {
    %c0_i32 = arith.constant 0 : i32
    %c0_i32_0 = arith.constant 0 : i32
    %c0_i32_1 = arith.constant 0 : i32
    return %c0_i32, %c0_i32_0 : i32, i32
  }
  func.func @transform_5(%arg0: i32) -> (i32, i32, i32) {
    %c0_i32 = arith.constant 0 : i32
    %c0_i32_0 = arith.constant 0 : i32
    %c0_i32_1 = arith.constant 0 : i32
    return %arg0, %c0_i32, %c0_i32_0 : i32, i32, i32
  }
}

module attributes {stable_mosaic.version = 11 : i64} {
  func.func @_output_kernel(%arg0: i32, %arg1: memref<8x128xf32, #tpu.memory_space<vmem>>, %arg2: memref<128x128xf32, #tpu.memory_space<vmem>>, %arg3: memref<1x128xf32, #tpu.memory_space<vmem>>, %arg4: memref<128x128xf32, #tpu.memory_space<vmem>>, %arg5: memref<1x128xf32, #tpu.memory_space<vmem>>, %arg6: memref<1x128xf32, #tpu.memory_space<vmem>>, %arg7: memref<1x128xf32, #tpu.memory_space<vmem>>, %arg8: memref<8x128xf32, #tpu.memory_space<vmem>>) attributes {dimension_semantics = [#tpu.dimension_semantics<parallel>], iteration_bounds = array<i64: 1>, scalar_prefetch = 0 : i64, scratch_operands = 0 : i64, tpu.core_type = #tpu.core_type<tc>, window_params = [{transform_indices = @transform_0, window_bounds = array<i64: 8, 128>}, {pipeline_mode = #tpu.pipeline_mode<synchronous>, transform_indices = @transform_1, window_bounds = array<i64: 128, 128>}, {pipeline_mode = #tpu.pipeline_mode<synchronous>, transform_indices = @transform_2, window_bounds = array<i64: 1, 128>}, {pipeline_mode = #tpu.pipeline_mode<synchronous>, transform_indices = @transform_3, window_bounds = array<i64: 128, 128>}, {pipeline_mode = #tpu.pipeline_mode<synchronous>, transform_indices = @transform_4, window_bounds = array<i64: 1, 128>}, {pipeline_mode = #tpu.pipeline_mode<synchronous>, transform_indices = @transform_5, window_bounds = array<i64: 1, 128>}, {pipeline_mode = #tpu.pipeline_mode<synchronous>, transform_indices = @transform_6, window_bounds = array<i64: 1, 128>}, {transform_indices = @transform_7, window_bounds = array<i64: 8, 128>}]} {
    %c0 = arith.constant 0 : index
    %c0_0 = arith.constant 0 : index
    %0 = vector.load %arg1[%c0, %c0_0] : memref<8x128xf32, #tpu.memory_space<vmem>>, vector<8x128xf32>
    %c0_1 = arith.constant 0 : index
    %c0_2 = arith.constant 0 : index
    %1 = vector.load %arg2[%c0_1, %c0_2] : memref<128x128xf32, #tpu.memory_space<vmem>>, vector<128x128xf32>
    %cst = arith.constant dense<0.000000e+00> : vector<8x128xf32>
    %2 = tpu.matmul %0, %1, %cst {dimension_numbers = #tpu.dot_dimension_numbers<[1], [0], [0], [1], [0, 0, 1, 1], [], []>} : vector<8x128xf32>, vector<128x128xf32>, vector<8x128xf32> -> vector<8x128xf32>
    %c0_3 = arith.constant 0 : index
    %c0_4 = arith.constant 0 : index
    %3 = vector.load %arg3[%c0_3, %c0_4] : memref<1x128xf32, #tpu.memory_space<vmem>>, vector<1x128xf32>
    %4 = vector.broadcast %3 : vector<1x128xf32> to vector<8x128xf32>
    %5 = arith.addf %2, %4 : vector<8x128xf32>
    %cst_5 = arith.constant 0.00999999977 : f32
    %6 = vector.broadcast %cst_5 : f32 to vector<8x128xf32>
    %7 = arith.mulf %6, %5 : vector<8x128xf32>
    %8 = arith.maximumf %5, %7 : vector<8x128xf32>
    %c0_6 = arith.constant 0 : index
    %c0_7 = arith.constant 0 : index
    %9 = vector.load %arg4[%c0_6, %c0_7] : memref<128x128xf32, #tpu.memory_space<vmem>>, vector<128x128xf32>
    %cst_8 = arith.constant dense<0.000000e+00> : vector<8x128xf32>
    %10 = tpu.matmul %8, %9, %cst_8 {dimension_numbers = #tpu.dot_dimension_numbers<[1], [0], [0], [1], [0, 0, 1, 1], [], []>} : vector<8x128xf32>, vector<128x128xf32>, vector<8x128xf32> -> vector<8x128xf32>
    %c0_9 = arith.constant 0 : index
    %c0_10 = arith.constant 0 : index
    %11 = vector.load %arg5[%c0_9, %c0_10] : memref<1x128xf32, #tpu.memory_space<vmem>>, vector<1x128xf32>
    %12 = vector.broadcast %11 : vector<1x128xf32> to vector<8x128xf32>
    %13 = arith.addf %10, %12 : vector<8x128xf32>
    %cst_11 = arith.constant 0.00999999977 : f32
    %14 = vector.broadcast %cst_11 : f32 to vector<8x128xf32>
    %15 = arith.mulf %14, %13 : vector<8x128xf32>
    %16 = arith.maximumf %13, %15 : vector<8x128xf32>
    %c0_12 = arith.constant 0 : index
    %c0_13 = arith.constant 0 : index
    %17 = vector.load %arg6[%c0_12, %c0_13] : memref<1x128xf32, #tpu.memory_space<vmem>>, vector<1x128xf32>
    %18 = vector.broadcast %17 : vector<1x128xf32> to vector<8x128xf32>
    %19 = arith.mulf %16, %18 : vector<8x128xf32>
    %c0_14 = arith.constant 0 : index
    %c0_15 = arith.constant 0 : index
    %20 = vector.load %arg7[%c0_14, %c0_15] : memref<1x128xf32, #tpu.memory_space<vmem>>, vector<1x128xf32>
    %21 = vector.broadcast %20 : vector<1x128xf32> to vector<8x128xf32>
    %22 = arith.addf %19, %21 : vector<8x128xf32>
    %c0_16 = arith.constant 0 : index
    %c0_17 = arith.constant 0 : index
    %23 = vector.load %arg8[%c0_16, %c0_17] : memref<8x128xf32, #tpu.memory_space<vmem>>, vector<8x128xf32>
    tpu.vector_store %arg8[%c0_16, %c0_17], %22 {strides = array<i32>} : memref<8x128xf32, #tpu.memory_space<vmem>>, vector<8x128xf32>,
    return
  }
  func.func @transform_0(%arg0: i32) -> (i32, i32) {
    %c0_i32 = arith.constant 0 : i32
    %c0_i32_0 = arith.constant 0 : i32
    return %arg0, %c0_i32 : i32, i32
  }
  func.func @transform_1(%arg0: i32) -> (i32, i32) {
    %c0_i32 = arith.constant 0 : i32
    %c0_i32_0 = arith.constant 0 : i32
    %c0_i32_1 = arith.constant 0 : i32
    return %c0_i32, %c0_i32_0 : i32, i32
  }
  func.func @transform_2(%arg0: i32) -> (i32, i32) {
    %c0_i32 = arith.constant 0 : i32
    %c0_i32_0 = arith.constant 0 : i32
    %c0_i32_1 = arith.constant 0 : i32
    return %c0_i32, %c0_i32_0 : i32, i32
  }
  func.func @transform_3(%arg0: i32) -> (i32, i32) {
    %c0_i32 = arith.constant 0 : i32
    %c0_i32_0 = arith.constant 0 : i32
    %c0_i32_1 = arith.constant 0 : i32
    return %c0_i32, %c0_i32_0 : i32, i32
  }
  func.func @transform_4(%arg0: i32) -> (i32, i32) {
    %c0_i32 = arith.constant 0 : i32
    %c0_i32_0 = arith.constant 0 : i32
    %c0_i32_1 = arith.constant 0 : i32
    return %c0_i32, %c0_i32_0 : i32, i32
  }
  func.func @transform_5(%arg0: i32) -> (i32, i32) {
    %c0_i32 = arith.constant 0 : i32
    %c0_i32_0 = arith.constant 0 : i32
    %c0_i32_1 = arith.constant 0 : i32
    return %c0_i32, %c0_i32_0 : i32, i32
  }
  func.func @transform_6(%arg0: i32) -> (i32, i32) {
    %c0_i32 = arith.constant 0 : i32
    %c0_i32_0 = arith.constant 0 : i32
    %c0_i32_1 = arith.constant 0 : i32
    return %c0_i32, %c0_i32_0 : i32, i32
  }
  func.func @transform_7(%arg0: i32) -> (i32, i32) {
    %c0_i32 = arith.constant 0 : i32
    %c0_i32_0 = arith.constant 0 : i32
    return %arg0, %c0_i32 : i32, i32
  }
}

</mosaic_0001>

<bundles_post_ra>
// kernel: leaky_relu_head.3
= control target key start
LH: loop header
LB: loop body
LE: loop exit
PB: predicated region body
PF: predicated region fallthrough
CT: control target
= control target key end

     0   :  { %vm70_vm0 = vcmask 1040384   ;;  %s155_s1 = inlined_call_operand.vmem [shape: f32[128,128], index: 1, kind: input, shape index: {}]   ;;  %s156_s2 = inlined_call_operand.vmem [shape: f32[1,128], index: 2, kind: input, shape index: {}]   ;;  %s157_s0 = inlined_call_operand.vmem [shape: f32[8,128], index: 0, kind: input, shape index: {}]   ;;  %s158_s3 = inlined_call_operand.vmem [shape: f32[1,2,128], index: 3, kind: output, shape index: {}]  }
   0x1   :  { %v30_v0 = vld [vmem:[%s155_s1 + $0x78] sm:$0xff]  ;;  %v29_v1 = vld [vmem:[%s155_s1 + $0x70] sm:$0xff]  ;;  %v28_v2 = vld [vmem:[%s155_s1 + $0x68] sm:$0xff] }
   0x2   :  { %35 = vmatpush.msra.mxu0 %v30_v0  ;;  %v27_v3 = vld [vmem:[%s155_s1 + $0x60] sm:$0xff]  ;;  %v26_v4 = vld [vmem:[%s155_s1 + $0x58] sm:$0xff]  ;;  %v25_v5 = vld [vmem:[%s155_s1 + $0x50] sm:$0xff] }
   0x3   :  { %v24_v6 = vld [vmem:[%s155_s1 + $0x48] sm:$0xff]  ;;  %v23_v7 = vld [vmem:[%s155_s1 + $0x40] sm:$0xff]  ;;  %v22_v8 = vld [vmem:[%s155_s1 + $0x38] sm:$0xff] }
   0x4   :  { %36 = vmatpush.msra.mxu0 %v29_v1  ;;  %v21_v9 = vld [vmem:[%s155_s1 + $0x30] sm:$0xff]  ;;  %v20_v10 = vld [vmem:[%s155_s1 + $0x28] sm:$0xff]  ;;  %v19_v11 = vld [vmem:[%s155_s1 + $0x20] sm:$0xff] }
   0x5   :  { %v18_v12 = vld [vmem:[%s155_s1 + $0x18] sm:$0xff]  ;;  %v17_v13 = vld [vmem:[%s155_s1 + $0x10] sm:$0xff]  ;;  %v16_v14 = vld [vmem:[%s155_s1 + $0x8] sm:$0xff] }
   0x6   :  { %37 = vmatpush.msra.mxu0 %v28_v2  ;;  %v15_v15 = vld [vmem:[%s155_s1] sm:$0xff] }
   0x7   :  { %v14_v16 = vld [vmem:[%s157_s0] sm:$0xff] }
   0x8   :  { %38 = vmatpush.msra.mxu0 %v27_v3  ;;  %v77_v17 = vld [vmem:[%s156_s2] ss:$0 sm:$0xff] }
   0xa   :  { %39 = vmatpush.msra.mxu0 %v26_v4 }
   0xc   :  { %40 = vmatpush.msra.mxu0 %v25_v5 }
   0xe   :  { %41 = vmatpush.msra.mxu0 %v24_v6 }
  0x10   :  { %42 = vmatpush.msra.mxu0 %v23_v7 }
  0x12   :  { %43 = vmatpush.msra.mxu0 %v22_v8 }
  0x14   :  { %44 = vmatpush.msra.mxu0 %v21_v9 }
  0x16   :  { %45 = vmatpush.msra.mxu0 %v20_v10 }
  0x18   :  { %46 = vmatpush.msra.mxu0 %v19_v11 }
  0x1a   :  { %47 = vmatpush.msra.mxu0 %v18_v12 }
  0x1c   :  { %48 = vmatpush.msra.mxu0 %v17_v13 }
  0x1e   :  { %49 = vmatpush.msra.mxu0 %v16_v14 }
  0x20   :  { %50 = vmatpush.msra.mxu0 %v15_v15 }
  0x21   :  { %51 = vmatmul.f32.vlgmr.msra.gmra.mxu0 %v14_v16 }
  0x9e   :  { %v52_v18 = vpop.f32.mrf.mxu0 }
  0x9f   :  { %v53_v19 = vadd.f32 %v77_v17, %v52_v18 }
  0xa1   :  { %v55_v20 = vmul.f32 0.01, %v53_v19 }
  0xa3   :  { %v56_v21 = vmax.f32 %v53_v19, %v55_v20 }
  0xa5   :  { %v57_v22 = vrot.slane %v56_v21, 4  ;;  %v63_v23 = vmul.f32 %v56_v21, %v56_v21 }
  0xa7   :  { %v58_v24 = vadd.f32 %v57_v22, %v56_v21  ;;  %v64_v25 = vrot.slane %v63_v23, 4 }
  0xa9   :  { %v59_v26 = vrot.slane %v58_v24, 2  ;;  %v65_v27 = vadd.f32 %v64_v25, %v63_v23 }
  0xab   :  { %v60_v28 = vadd.f32 %v59_v26, %v58_v24  ;;  %v66_v29 = vrot.slane %v65_v27, 2 }
  0xad   :  { %v61_v30 = vrot.slane %v60_v28, 1  ;;  %v67_v31 = vadd.f32 %v66_v29, %v65_v27 }
  0xaf   :  { %v68_v32 = vrot.slane %v67_v31, 1  ;;  %v62_v33 = vadd.f32 %v61_v30, %v60_v28 }
  0xb1   :  { %v69_v34 = vadd.f32 %v68_v32, %v67_v31 }
  0xb3   :  { %v71_v35 = vsel %vm70_vm0, %v62_v33, %v69_v34 }
  0xb4   :  { %72 = vst [vmem:[%s158_s3] sm:$0x3] %v71_v35 }

// kernel: leaky_relu_head.4
= control target key start
LH: loop header
LB: loop body
LE: loop exit
PB: predicated region body
PF: predicated region fallthrough
CT: control target
= control target key end

     0   :  { %vm118_vm0 = vcmask 1040384   ;;  %s265_s1 = inlined_call_operand.vmem [shape: f32[128,128], index: 1, kind: input, shape index: {}]   ;;  %s266_s3 = inlined_call_operand.vmem [shape: f32[128,128], index: 3, kind: input, shape index: {}]   ;;  %s267_s2 = inlined_call_operand.vmem [shape: f32[1,128], index: 2, kind: input, shape index: {}]   ;;  %s268_s0 = inlined_call_operand.vmem [shape: f32[8,128], index: 0, kind: input, shape index: {}]   ;;  %s269_s4 = inlined_call_operand.vmem [shape: f32[1,128], index: 4, kind: input, shape index: {}]   ;;  %s270_s5 = inlined_call_operand.vmem [shape: f32[1,2,128], index: 5, kind: output, shape index: {}]  }
   0x1   :  { %v36_v0 = vld [vmem:[%s265_s1 + $0x78] sm:$0xff]  ;;  %v35_v1 = vld [vmem:[%s265_s1 + $0x70] sm:$0xff]  ;;  %v34_v2 = vld [vmem:[%s265_s1 + $0x68] sm:$0xff] }
   0x2   :  { %41 = vmatpush.msra.mxu0 %v36_v0  ;;  %v33_v3 = vld [vmem:[%s265_s1 + $0x60] sm:$0xff]  ;;  %v78_v4 = vld [vmem:[%s266_s3 + $0x78] sm:$0xff]  ;;  %v77_v6 = vld [vmem:[%s266_s3 + $0x70] sm:$0xff] }
   0x3   :  { %v32_v5 = vld [vmem:[%s265_s1 + $0x58] sm:$0xff]  ;;  %83 = vmatpush.msra.mxu1 %v78_v4  ;;  %v76_v7 = vld [vmem:[%s266_s3 + $0x68] sm:$0xff]  ;;  %v31_v8 = vld [vmem:[%s265_s1 + $0x50] sm:$0xff] }
   0x4   :  { %42 = vmatpush.msra.mxu0 %v35_v1  ;;  %v75_v9 = vld [vmem:[%s266_s3 + $0x60] sm:$0xff]  ;;  %v30_v10 = vld [vmem:[%s265_s1 + $0x48] sm:$0xff]  ;;  %v74_v11 = vld [vmem:[%s266_s3 + $0x58] sm:$0xff] }
   0x5   :  { %84 = vmatpush.msra.mxu1 %v77_v6  ;;  %v29_v12 = vld [vmem:[%s265_s1 + $0x40] sm:$0xff]  ;;  %v73_v13 = vld [vmem:[%s266_s3 + $0x50] sm:$0xff]  ;;  %v28_v14 = vld [vmem:[%s265_s1 + $0x38] sm:$0xff] }
   0x6   :  { %43 = vmatpush.msra.mxu0 %v34_v2  ;;  %v72_v15 = vld [vmem:[%s266_s3 + $0x48] sm:$0xff]  ;;  %v27_v16 = vld [vmem:[%s265_s1 + $0x30] sm:$0xff]  ;;  %v71_v17 = vld [vmem:[%s266_s3 + $0x40] sm:$0xff] }
   0x7   :  { %85 = vmatpush.msra.mxu1 %v76_v7  ;;  %v26_v18 = vld [vmem:[%s265_s1 + $0x28] sm:$0xff]  ;;  %v70_v19 = vld [vmem:[%s266_s3 + $0x38] sm:$0xff]  ;;  %v25_v20 = vld [vmem:[%s265_s1 + $0x20] sm:$0xff] }
   0x8   :  { %44 = vmatpush.msra.mxu0 %v33_v3  ;;  %v69_v21 = vld [vmem:[%s266_s3 + $0x30] sm:$0xff]  ;;  %v24_v22 = vld [vmem:[%s265_s1 + $0x18] sm:$0xff]  ;;  %v68_v23 = vld [vmem:[%s266_s3 + $0x28] sm:$0xff] }
   0x9   :  { %86 = vmatpush.msra.mxu1 %v75_v9  ;;  %v23_v24 = vld [vmem:[%s265_s1 + $0x10] sm:$0xff]  ;;  %v67_v25 = vld [vmem:[%s266_s3 + $0x20] sm:$0xff]  ;;  %v22_v26 = vld [vmem:[%s265_s1 + $0x8] sm:$0xff] }
   0xa   :  { %45 = vmatpush.msra.mxu0 %v32_v5  ;;  %v21_v27 = vld [vmem:[%s265_s1] sm:$0xff]  ;;  %v66_v29 = vld [vmem:[%s266_s3 + $0x18] sm:$0xff]  ;;  %v65_v30 = vld [vmem:[%s266_s3 + $0x10] sm:$0xff] }
   0xb   :  { %87 = vmatpush.msra.mxu1 %v74_v11  ;;  %v20_v28 = vld [vmem:[%s268_s0] sm:$0xff]  ;;  %v64_v31 = vld [vmem:[%s266_s3 + $0x8] sm:$0xff] }
   0xc   :  { %46 = vmatpush.msra.mxu0 %v31_v8  ;;  %v63_v32 = vld [vmem:[%s266_s3] sm:$0xff] }
   0xd   :  { %88 = vmatpush.msra.mxu1 %v73_v13  ;;  %v125_v33 = vld [vmem:[%s267_s2] ss:$0 sm:$0xff] }
   0xe   :  { %47 = vmatpush.msra.mxu0 %v30_v10  ;;  %v126_v38 = vld [vmem:[%s269_s4] ss:$0 sm:$0xff] }
   0xf   :  { %89 = vmatpush.msra.mxu1 %v72_v15 }
  0x10   :  { %48 = vmatpush.msra.mxu0 %v29_v12 }
  0x11   :  { %90 = vmatpush.msra.mxu1 %v71_v17 }
  0x12   :  { %49 = vmatpush.msra.mxu0 %v28_v14 }
  0x13   :  { %91 = vmatpush.msra.mxu1 %v70_v19 }
  0x14   :  { %50 = vmatpush.msra.mxu0 %v27_v16 }
  0x15   :  { %92 = vmatpush.msra.mxu1 %v69_v21 }
  0x16   :  { %51 = vmatpush.msra.mxu0 %v26_v18 }
  0x17   :  { %93 = vmatpush.msra.mxu1 %v68_v23 }
  0x18   :  { %52 = vmatpush.msra.mxu0 %v25_v20 }
  0x19   :  { %94 = vmatpush.msra.mxu1 %v67_v25 }
  0x1a   :  { %53 = vmatpush.msra.mxu0 %v24_v22 }
  0x1b   :  { %95 = vmatpush.msra.mxu1 %v66_v29 }
  0x1c   :  { %54 = vmatpush.msra.mxu0 %v23_v24 }
  0x1d   :  { %96 = vmatpush.msra.mxu1 %v65_v30 }
  0x1e   :  { %55 = vmatpush.msra.mxu0 %v22_v26 }
  0x1f   :  { %97 = vmatpush.msra.mxu1 %v64_v31 }
  0x20   :  { %56 = vmatpush.msra.mxu0 %v21_v27 }
  0x21   :  { %57 = vmatmul.f32.vlgmr.msra.gmra.mxu0 %v20_v28  ;;  %98 = vmatpush.msra.mxu1 %v63_v32 }
  0x9e   :  { %v58_v34 = vpop.f32.mrf.mxu0 }
  0x9f   :  { %v59_v35 = vadd.f32 %v125_v33, %v58_v34 }
  0xa1   :  { %v61_v36 = vmul.f32 0.01, %v59_v35 }
  0xa3   :  { %v62_v37 = vmax.f32 %v59_v35, %v61_v36 }
  0xa5   :  { %99 = vmatmul.f32.vlgmr.msra.gmra.mxu1 %v62_v37 }
 0x122   :  { %v100_v39 = vpop.f32.mrf.mxu1 }
 0x123   :  { %v101_v40 = vadd.f32 %v126_v38, %v100_v39 }
 0x125   :  { %v103_v41 = vmul.f32 0.01, %v101_v40 }
 0x127   :  { %v104_v42 = vmax.f32 %v101_v40, %v103_v41 }
 0x129   :  { %v105_v43 = vrot.slane %v104_v42, 4  ;;  %v111_v44 = vmul.f32 %v104_v42, %v104_v42 }
 0x12b   :  { %v106_v45 = vadd.f32 %v105_v43, %v104_v42  ;;  %v112_v46 = vrot.slane %v111_v44, 4 }
 0x12d   :  { %v107_v47 = vrot.slane %v106_v45, 2  ;;  %v113_v48 = vadd.f32 %v112_v46, %v111_v44 }
 0x12f   :  { %v108_v49 = vadd.f32 %v107_v47, %v106_v45  ;;  %v114_v50 = vrot.slane %v113_v48, 2 }
 0x131   :  { %v109_v51 = vrot.slane %v108_v49, 1  ;;  %v115_v52 = vadd.f32 %v114_v50, %v113_v48 }
 0x133   :  { %v116_v53 = vrot.slane %v115_v52, 1  ;;  %v110_v54 = vadd.f32 %v109_v51, %v108_v49 }
 0x135   :  { %v117_v55 = vadd.f32 %v116_v53, %v115_v52 }
 0x137   :  { %v119_v56 = vsel %vm118_vm0, %v110_v54, %v117_v55 }
 0x138   :  { %120 = vst [vmem:[%s270_s5] sm:$0x3] %v119_v56 }

// kernel: leaky_relu_head.5
= control target key start
LH: loop header
LB: loop body
LE: loop exit
PB: predicated region body
PF: predicated region fallthrough
CT: control target
= control target key end

     0   :  { %s325_s0 = inlined_call_operand.vmem [shape: f32[8,128], index: 0, kind: input, shape index: {}]   ;;  %s326_s1 = inlined_call_operand.vmem [shape: f32[128,128], index: 1, kind: input, shape index: {}]   ;;  %s327_s2 = inlined_call_operand.vmem [shape: f32[1,128], index: 2, kind: input, shape index: {}]   ;;  %s328_s3 = inlined_call_operand.vmem [shape: f32[128,128], index: 3, kind: input, shape index: {}]   ;;  %s329_s4 = inlined_call_operand.vmem [shape: f32[1,128], index: 4, kind: input, shape index: {}]   ;;  %s330_s5 = inlined_call_operand.vmem [shape: f32[1,128], index: 5, kind: input, shape index: {}]   ;;  %s331_s6 = inlined_call_operand.vmem [shape: f32[1,128], index: 6, kind: input, shape index: {}]   ;;  %s332_s7 = inlined_call_operand.hbm [shape: f32[8,128], index: 7, kind: output, shape index: {}]  }
   0x1   :  { %v43_v0 = vld [vmem:[%s326_s1 + $0x78] sm:$0xff]  ;;  %v42_v1 = vld [vmem:[%s326_s1 + $0x70] sm:$0xff]  ;;  %v41_v2 = vld [vmem:[%s326_s1 + $0x68] sm:$0xff] }
   0x2   :  { %48 = vmatpush.msra.mxu0 %v43_v0  ;;  %v40_v3 = vld [vmem:[%s326_s1 + $0x60] sm:$0xff]  ;;  %v85_v4 = vld [vmem:[%s328_s3 + $0x78] sm:$0xff]  ;;  %v84_v6 = vld [vmem:[%s328_s3 + $0x70] sm:$0xff] }
   0x3   :  { %v39_v5 = vld [vmem:[%s326_s1 + $0x58] sm:$0xff]  ;;  %90 = vmatpush.msra.mxu1 %v85_v4  ;;  %v83_v7 = vld [vmem:[%s328_s3 + $0x68] sm:$0xff]  ;;  %v38_v8 = vld [vmem:[%s326_s1 + $0x50] sm:$0xff] }
   0x4   :  { %49 = vmatpush.msra.mxu0 %v42_v1  ;;  %v82_v9 = vld [vmem:[%s328_s3 + $0x60] sm:$0xff]  ;;  %v37_v10 = vld [vmem:[%s326_s1 + $0x48] sm:$0xff]  ;;  %v81_v11 = vld [vmem:[%s328_s3 + $0x58] sm:$0xff] }
   0x5   :  { %91 = vmatpush.msra.mxu1 %v84_v6 }
   0x6   :  { %50 = vmatpush.msra.mxu0 %v41_v2 }
   0x7   :  { %92 = vmatpush.msra.mxu1 %v83_v7 }
   0x8   :  { %51 = vmatpush.msra.mxu0 %v40_v3 }
   0xa   :  { %52 = vmatpush.msra.mxu0 %v39_v5 }
   0xc   :  { %53 = vmatpush.msra.mxu0 %v38_v8 }
   0xd   :  { %12 = vsyncpa [#allocation3], 0  ;;  %v36_v12 = vld [vmem:[%s326_s1 + $0x40] sm:$0xff]  ;;  %93 = vmatpush.msra.mxu1 %v82_v9  ;;  %v80_v13 = vld [vmem:[%s328_s3 + $0x50] sm:$0xff]  ;;  %s130_s29 = sshll.u32 %s332_s7, 4  ;;  %s131_s29 = int_to_ptr.hbm [resolvable:$true] %s130_s29 }
   0xe   :  { %54 = vmatpush.msra.mxu0 %v37_v10  ;;  %v35_v14 = vld [vmem:[%s326_s1 + $0x38] sm:$0xff]  ;;  %v79_v15 = vld [vmem:[%s328_s3 + $0x48] sm:$0xff]  ;;  %v34_v16 = vld [vmem:[%s326_s1 + $0x30] sm:$0xff] }
   0xf   :  { %94 = vmatpush.msra.mxu1 %v81_v11  ;;  %v78_v17 = vld [vmem:[%s328_s3 + $0x40] sm:$0xff]  ;;  %v33_v18 = vld [vmem:[%s326_s1 + $0x28] sm:$0xff]  ;;  %v77_v19 = vld [vmem:[%s328_s3 + $0x38] sm:$0xff] }
  0x10   :  { %55 = vmatpush.msra.mxu0 %v36_v12  ;;  %v32_v20 = vld [vmem:[%s326_s1 + $0x20] sm:$0xff]  ;;  %v76_v21 = vld [vmem:[%s328_s3 + $0x30] sm:$0xff]  ;;  %v31_v22 = vld [vmem:[%s326_s1 + $0x18] sm:$0xff] }
  0x11   :  { %95 = vmatpush.msra.mxu1 %v80_v13  ;;  %v75_v23 = vld [vmem:[%s328_s3 + $0x28] sm:$0xff]  ;;  %v30_v24 = vld [vmem:[%s326_s1 + $0x10] sm:$0xff]  ;;  %v74_v25 = vld [vmem:[%s328_s3 + $0x20] sm:$0xff] }
  0x12   :  { %56 = vmatpush.msra.mxu0 %v35_v14  ;;  %v29_v26 = vld [vmem:[%s326_s1 + $0x8] sm:$0xff]  ;;  %v28_v27 = vld [vmem:[%s326_s1] sm:$0xff]  ;;  %v73_v29 = vld [vmem:[%s328_s3 + $0x18] sm:$0xff] }
  0x13   :  { %96 = vmatpush.msra.mxu1 %v79_v15  ;;  %v27_v28 = vld [vmem:[%s325_s0] sm:$0xff]  ;;  %v72_v30 = vld [vmem:[%s328_s3 + $0x10] sm:$0xff]  ;;  %v71_v31 = vld [vmem:[%s328_s3 + $0x8] sm:$0xff] }
  0x14   :  { %57 = vmatpush.msra.mxu0 %v34_v16  ;;  %v70_v32 = vld [vmem:[%s328_s3] sm:$0xff] }
  0x15   :  { %97 = vmatpush.msra.mxu1 %v78_v17  ;;  %v140_v33 = vld [vmem:[%s327_s2] ss:$0 sm:$0xff]  ;;  %s170_s2 = smov [#allocation2]  }
  0x16   :  { %58 = vmatpush.msra.mxu0 %v33_v18  ;;  %v141_v38 = vld [vmem:[%s329_s4] ss:$0 sm:$0xff]  ;;  %s128_s26 = sshll.u32 %s170_s2, 4  ;;  %s129_s26 = int_to_ptr.vmem [resolvable:$true] %s128_s26 }
  0x17   :  { %98 = vmatpush.msra.mxu1 %v77_v19  ;;  %v142_v42 = vld [vmem:[%s330_s5] ss:$0 sm:$0xff] }
  0x18   :  { %59 = vmatpush.msra.mxu0 %v32_v20  ;;  %v143_v44 = vld [vmem:[%s331_s6] ss:$0 sm:$0xff] }
  0x19   :  { %99 = vmatpush.msra.mxu1 %v76_v21 }
  0x1a   :  { %60 = vmatpush.msra.mxu0 %v31_v22 }
  0x1b   :  { %100 = vmatpush.msra.mxu1 %v75_v23 }
  0x1c   :  { %61 = vmatpush.msra.mxu0 %v30_v24 }
  0x1d   :  { %101 = vmatpush.msra.mxu1 %v74_v25 }
  0x1e   :  { %62 = vmatpush.msra.mxu0 %v29_v26 }
  0x1f   :  { %102 = vmatpush.msra.mxu1 %v73_v29 }
  0x20   :  { %63 = vmatpush.msra.mxu0 %v28_v27 }
  0x21   :  { %64 = vmatmul.f32.vlgmr.msra.gmra.mxu0 %v27_v28  ;;  %103 = vmatpush.msra.mxu1 %v72_v30 }
  0x23   :  { %104 = vmatpush.msra.mxu1 %v71_v31 }
  0x25   :  { %105 = vmatpush.msra.mxu1 %v70_v32 }
  0x9e   :  { %v65_v34 = vpop.f32.mrf.mxu0 }
  0x9f   :  { %v66_v35 = vadd.f32 %v140_v33, %v65_v34 }
  0xa1   :  { %v68_v36 = vmul.f32 0.01, %v66_v35 }
  0xa3   :  { %v69_v37 = vmax.f32 %v66_v35, %v68_v36 }
  0xa5   :  { %106 = vmatmul.f32.vlgmr.msra.gmra.mxu1 %v69_v37 }
 0x122   :  { %v107_v39 = vpop.f32.mrf.mxu1 }
 0x123   :  { %v108_v40 = vadd.f32 %v141_v38, %v107_v39 }
 0x125   :  { %v110_v41 = vmul.f32 0.01, %v108_v40 }
 0x127   :  { %v111_v43 = vmax.f32 %v108_v40, %v110_v41 }
 0x129   :  { %v116_v45 = vmul.f32 %v142_v42, %v111_v43 }
 0x12b   :  { %v121_v46 = vadd.f32 %v143_v44, %v116_v45 }
 0x12d   :  { %122 = vst [vmem:[#allocation2] sm:$0xff] %v121_v46 }
 0x12e   :  { %133 = dma.vmem_to_hbm [thread:$0]  %s129_s26, 128, %s131_s29, [#allocation3]  }
 0x12f   :  { %168 = dma.done.wait [#allocation3], 128  }
 0x130   :  { %169 = vsyncadd [#allocation3], 4294967168 }
 0x131   :  { %138 = vsyncpa [#allocation3], 1 }

</bundles_post_ra>
